<compile_context>
chip_gen: v7x
topology: tpu7x:2x2x1
jax: 0.10.0
libtpu: 0.0.40
codegen_flags: <defaults>
</compile_context>

<pallas_src>
import jax
import jax.numpy as jnp
from jax.experimental import pallas as pl
from jax.experimental.pallas import tpu as pltpu


# ----------------------------------------------------------------------------
# helpers
# ----------------------------------------------------------------------------
def _pick_tile(dim, candidates):
    for c in candidates:
        if dim % c == 0:
            return c
    return dim  # fall back to the full (untiled) dimension


def _vmem_limit_bytes():
    cap = 64 * 1024 * 1024  # conservative default == v7x physical VMEM
    try:
        cap = int(pltpu.get_tpu_info().vmem_capacity_bytes)
    except Exception:
        pass
    # ~25% headroom: 96 MiB on v5e/v6e (128 MiB phys), 48 MiB on v7x (64 MiB).
    return min(96 * 1024 * 1024, (cap * 3) // 4)


# ----------------------------------------------------------------------------
# Pallas kernel 1: GEMM (bf16 operands, f32 accumulation in the output block)
#                  + per-M-tile sum / sum-of-squares for BatchNorm stats.
# ----------------------------------------------------------------------------
def _gemm_stats_kernel(a_ref, b_ref, y_ref, st_ref):
    k = pl.program_id(1)

    @pl.when(k == 0)
    def _():
        y_ref[...] = jnp.zeros_like(y_ref)

    y_ref[...] += jnp.dot(a_ref[...], b_ref[...],
                          preferred_element_type=jnp.float32)

    @pl.when(k == pl.num_programs(1) - 1)
    def _():
        y = y_ref[...]                                   # (tm, Cout) f32
        ssum = jnp.sum(y, axis=0, keepdims=True)         # (1, Cout)
        ssq = jnp.sum(y * y, axis=0, keepdims=True)      # (1, Cout)
        st_ref[...] = jnp.concatenate([ssum, ssq], axis=0)[None, :, :]


def _conv_gemm(a_bf16, b_bf16):
    """(M, K) @ (K, Cout) -> (Y f32 (M, Cout), stats f32 (M_tiles, 2, Cout))."""
    M, K = a_bf16.shape
    _, Cout = b_bf16.shape
    tm = _pick_tile(M, (256, 128, 64, 32, 16, 8))
    tk = _pick_tile(K, (512, 256, 128))
    grid = (M // tm, K // tk)

    y, stats = pl.pallas_call(
        _gemm_stats_kernel,
        out_shape=(
            jax.ShapeDtypeStruct((M, Cout), jnp.float32),
            jax.ShapeDtypeStruct((grid[0], 2, Cout), jnp.float32),
        ),
        grid_spec=pltpu.PrefetchScalarGridSpec(
            num_scalar_prefetch=0,
            grid=grid,
            in_specs=[
                pl.BlockSpec((tm, tk), lambda i, k: (i, k)),
                pl.BlockSpec((tk, Cout), lambda i, k: (k, 0)),
            ],
            out_specs=[
                pl.BlockSpec((tm, Cout), lambda i, k: (i, 0)),
                pl.BlockSpec((1, 2, Cout), lambda i, k: (i, 0, 0)),
            ],
        ),
        compiler_params=pltpu.CompilerParams(
            dimension_semantics=("parallel", "arbitrary"),
            vmem_limit_bytes=_vmem_limit_bytes(),
        ),
    )(a_bf16, b_bf16)
    return y, stats


# ----------------------------------------------------------------------------
# Pallas kernel 2: per-channel scale/shift (folded BatchNorm) + LeakyReLU(0.01)
# ----------------------------------------------------------------------------
def _scale_shift_leaky_kernel(y_ref, s_ref, o_ref):
    y = y_ref[...] * s_ref[0:1, :] + s_ref[1:2, :]
    o_ref[...] = jnp.where(y >= 0.0, y, 0.01 * y).astype(o_ref.dtype)


def _scale_shift_leaky(y_f32, scale_shift, out_dtype):
    M, Cout = y_f32.shape
    tm = _pick_tile(M, (512, 256, 128, 64, 32, 16, 8))
    return pl.pallas_call(
        _scale_shift_leaky_kernel,
        out_shape=jax.ShapeDtypeStruct((M, Cout), out_dtype),
        grid_spec=pltpu.PrefetchScalarGridSpec(
            num_scalar_prefetch=0,
            grid=(M // tm,),
            in_specs=[
                pl.BlockSpec((tm, Cout), lambda i: (i, 0)),
                pl.BlockSpec((2, Cout), lambda i: (0, 0)),
            ],
            out_specs=pl.BlockSpec((tm, Cout), lambda i: (i, 0)),
        ),
        compiler_params=pltpu.CompilerParams(
            dimension_semantics=("parallel",),
            vmem_limit_bytes=_vmem_limit_bytes(),
        ),
    )(y_f32, scale_shift)


# ----------------------------------------------------------------------------
# One conv layer: im2col glue + GEMM kernel + (BN+LeakyReLU kernel | bias)
# ----------------------------------------------------------------------------
def conv_layer(x_nhwc, w, aux, *, stride, padding, apply_bn, eps=1e-5):
    """x_nhwc: (N, H, W, Cin); w: (Cout, Cin, KH, KW) PyTorch layout.
    aux: (2, Cout) stacked (gamma, beta) for BN layers, or (Cout,) bias for
    the final plain conv."""
    N, H, W, Cin = x_nhwc.shape
    Cout, _, KH, KW = w.shape
    OH = (H + 2 * padding - KH) // stride + 1
    OW = (W + 2 * padding - KW) // stride + 1

    # --- im2col glue (bf16 to halve the duplicated-activation HBM traffic) ---
    # TODO(synk): fuse im2col into the GEMM kernel (manual strided DMA per
    # (kh, kw) tap) instead of materializing the 16x-duplicated matrix in HBM.
    xb = x_nhwc.astype(jnp.bfloat16)
    xp = jnp.pad(xb, ((0, 0), (padding, padding), (padding, padding), (0, 0)))
    cols = []
    for kh in range(KH):
        for kw in range(KW):
            cols.append(xp[:, kh:kh + stride * OH:stride,
                           kw:kw + stride * OW:stride, :])
    A = jnp.concatenate(cols, axis=-1).reshape(N * OH * OW, KH * KW * Cin)
    # (Cout, Cin, KH, KW) -> (KH, KW, Cin, Cout) -> (KH*KW*Cin, Cout), bf16
    B = jnp.transpose(w, (2, 3, 1, 0)).reshape(KH * KW * Cin, Cout)
    B = B.astype(jnp.bfloat16)

    M = N * OH * OW
    if apply_bn:
        y, stats = _conv_gemm(A, B)                      # (M, Cout) f32
        s = jnp.sum(stats, axis=0)                       # (2, Cout)
        mean = s[0] / M
        var = s[1] / M - mean * mean   # biased variance == PyTorch training BN
        gamma, beta = aux[0], aux[1]
        scale = gamma * jax.lax.rsqrt(var + eps)
        shift = beta - mean * scale
        ss = jnp.stack([scale, shift], axis=0).astype(jnp.float32)
        out = _scale_shift_leaky(y, ss, jnp.bfloat16)    # (M, Cout) bf16
    else:
        # Final 1024 -> 1 conv: pad Cout to 128 lanes so the MXU shape and the
        # output stores stay lane-dense; bias + column slice handled in JAX.
        Cp = 128
        Bp = jnp.zeros((B.shape[0], Cp), jnp.bfloat16).at[:, :Cout].set(B)
        y, _ = _conv_gemm(A, Bp)
        out = y[:, :Cout] + aux[None, :]                 # (M, Cout) f32

    return out.reshape(N, OH, OW, Cout)


# ----------------------------------------------------------------------------
# Critic forward: NCHW in -> NCHW out (N, 1, 1, 1)
# ----------------------------------------------------------------------------
def critic_forward(x_nchw, layer_params):
    x = jnp.transpose(x_nchw, (0, 2, 3, 1))  # NCHW -> NHWC
    for (w, aux, stride, padding, apply_bn) in layer_params:
        x = conv_layer(x, w, aux, stride=stride, padding=padding,
                       apply_bn=apply_bn)
    # final: (N, 1, 1, 1) NHWC == NCHW for a single channel / 1x1 spatial
    return jnp.transpose(x, (0, 3, 1, 2))


def build_critic_params(key, image_size):
    """Mirror Critic.__init__ channel schedule; deterministic init."""
    log2 = int(jnp.log2(jnp.array(image_size, jnp.float32)))
    chans = [(3, 2 ** (10 - log2 + 3))]
    for i in range(log2 - 3):
        chans.append((2 ** (10 - log2 + i + 3), 2 ** (10 - log2 + i + 4)))

    params = []
    for (ci, co) in chans:
        key, kw = jax.random.split(key)
        w = jax.random.normal(kw, (co, ci, 4, 4), jnp.float32) * 0.05
        gamma = jnp.ones((co,), jnp.float32)   # PyTorch BN default init
        beta = jnp.zeros((co,), jnp.float32)
        params.append((w, jnp.stack([gamma, beta], axis=0), 2, 1, True))

    # final layer: Conv2d(1024, 1, 4, 1, 0) with bias, no BN / activation
    key, kw, kb = jax.random.split(key, 3)
    w_last = jax.random.normal(kw, (1, 1024, 4, 4), jnp.float32) * 0.05
    b_last = jax.random.normal(kb, (1,), jnp.float32) * 0.05
    params.append((w_last, b_last, 1, 0, False))
    return params


if __name__ == "__main__":
    image_size = 16          # layers: 3->512->1024 (stride 2), then 1024->1
    key = jax.random.PRNGKey(0)
    key, kx = jax.random.split(key)
    x = jax.random.normal(kx, (2, 3, image_size, image_size), jnp.float32)  # NCHW

    layer_params = build_critic_params(key, image_size)

    out = critic_forward(x, layer_params)
    out = jax.block_until_ready(out)
    assert out.shape == (2, 1, 1, 1), out.shape
    assert jnp.all(jnp.isfinite(out))
    print("KERNEL_OK")
</pallas_src>

<mosaic_0001>
module attributes {stable_mosaic.version = 11 : i64} {
  func.func @_gemm_stats_kernel(%arg0: i32, %arg1: i32, %arg2: memref<128x48xbf16, #tpu.memory_space<vmem>>, %arg3: memref<48x512xbf16, #tpu.memory_space<vmem>>, %arg4: memref<128x512xf32, #tpu.memory_space<vmem>>, %arg5: memref<1x2x512xf32, #tpu.memory_space<vmem>>) attributes {dimension_semantics = [#tpu.dimension_semantics<parallel>, #tpu.dimension_semantics<arbitrary>], iteration_bounds = array<i64: 1, 1>, scalar_prefetch = 0 : i64, scratch_operands = 0 : i64, tpu.core_type = #tpu.core_type<tc>, window_params = [{transform_indices = @transform_0, window_bounds = array<i64: 128, 48>}, {transform_indices = @transform_1, window_bounds = array<i64: 48, 512>}, {transform_indices = @transform_2, window_bounds = array<i64: 128, 512>}, {transform_indices = @transform_3, window_bounds = array<i64: 1, 2, 512>}]} {
    %c0_i32 = arith.constant 0 : i32
    %0 = arith.cmpi eq, %arg1, %c0_i32 : i32
    %1 = arith.extui %0 : i1 to i32
    %c0_i32_0 = arith.constant 0 : i32
    %2 = arith.cmpi ne, %1, %c0_i32_0 : i32
    scf.if %2 {
      %cst_10 = arith.constant 0.000000e+00 : f32
      %12 = vector.broadcast %cst_10 : f32 to vector<128x512xf32>
      %c0_11 = arith.constant 0 : index
      %c0_12 = arith.constant 0 : index
      %13 = vector.load %arg4[%c0_11, %c0_12] : memref<128x512xf32, #tpu.memory_space<vmem>>, vector<128x512xf32>
      tpu.vector_store %arg4[%c0_11, %c0_12], %12 {strides = array<i32>} : memref<128x512xf32, #tpu.memory_space<vmem>>, vector<128x512xf32>,
    } else {
    }
    %c0 = arith.constant 0 : index
    %c0_1 = arith.constant 0 : index
    %3 = vector.load %arg4[%c0, %c0_1] : memref<128x512xf32, #tpu.memory_space<vmem>>, vector<128x512xf32>
    %c0_2 = arith.constant 0 : index
    %c0_3 = arith.constant 0 : index
    %4 = vector.load %arg2[%c0_2, %c0_3] : memref<128x48xbf16, #tpu.memory_space<vmem>>, vector<128x48xbf16>
    %c0_4 = arith.constant 0 : index
    %c0_5 = arith.constant 0 : index
    %5 = vector.load %arg3[%c0_4, %c0_5] : memref<48x512xbf16, #tpu.memory_space<vmem>>, vector<48x512xbf16>
    %cst = arith.constant dense<0.000000e+00> : vector<128x512xf32>
    %6 = tpu.matmul %4, %5, %cst {dimension_numbers = #tpu.dot_dimension_numbers<[1], [0], [0], [1], [0, 0, 1, 1], [], []>} : vector<128x48xbf16>, vector<48x512xbf16>, vector<128x512xf32> -> vector<128x512xf32>
    %7 = arith.addf %3, %6 : vector<128x512xf32>
    %c0_6 = arith.constant 0 : index
    %c0_7 = arith.constant 0 : index
    %8 = vector.load %arg4[%c0_6, %c0_7] : memref<128x512xf32, #tpu.memory_space<vmem>>, vector<128x512xf32>
    tpu.vector_store %arg4[%c0_6, %c0_7], %7 {strides = array<i32>} : memref<128x512xf32, #tpu.memory_space<vmem>>, vector<128x512xf32>,
    %c0_i32_8 = arith.constant 0 : i32
    %9 = arith.cmpi eq, %arg1, %c0_i32_8 : i32
    %10 = arith.extui %9 : i1 to i32
    %c0_i32_9 = arith.constant 0 : i32
    %11 = arith.cmpi ne, %10, %c0_i32_9 : i32
    scf.if %11 {
      %c0_10 = arith.constant 0 : index
      %c0_11 = arith.constant 0 : index
      %12 = vector.load %arg4[%c0_10, %c0_11] : memref<128x512xf32, #tpu.memory_space<vmem>>, vector<128x512xf32>
      %cst_12 = arith.constant dense<0.000000e+00> : vector<512xf32>
      %13 = vector.multi_reduction <add>, %12, %cst_12 [0] : vector<128x512xf32> to vector<512xf32>
      %14 = vector.shape_cast %13 : vector<512xf32> to vector<1x512xf32>
      %15 = arith.mulf %12, %12 : vector<128x512xf32>
      %cst_13 = arith.constant dense<0.000000e+00> : vector<512xf32>
      %16 = vector.multi_reduction <add>, %15, %cst_13 [0] : vector<128x512xf32> to vector<512xf32>
      %17 = vector.shape_cast %16 : vector<512xf32> to vector<1x512xf32>
      %18 = tpu.concatenate %14, %17 in 0 : vector<1x512xf32>, vector<1x512xf32> -> vector<2x512xf32>
      %19 = vector.shape_cast %18 : vector<2x512xf32> to vector<1x2x512xf32>
      %c0_14 = arith.constant 0 : index
      %c0_15 = arith.constant 0 : index
      %c0_16 = arith.constant 0 : index
      %20 = vector.load %arg5[%c0_14, %c0_15, %c0_16] : memref<1x2x512xf32, #tpu.memory_space<vmem>>, vector<1x2x512xf32>
      tpu.vector_store %arg5[%c0_14, %c0_15, %c0_16], %19 {strides = array<i32>} : memref<1x2x512xf32, #tpu.memory_space<vmem>>, vector<1x2x512xf32>,
    } else {
    }
    return
  }
  func.func @transform_0(%arg0: i32, %arg1: i32) -> (i32, i32) {
    %c0_i32 = arith.constant 0 : i32
    return %arg0, %arg1 : i32, i32
  }
  func.func @transform_1(%arg0: i32, %arg1: i32) -> (i32, i32) {
    %c0_i32 = arith.constant 0 : i32
    %c0_i32_0 = arith.constant 0 : i32
    return %arg1, %c0_i32 : i32, i32
  }
  func.func @transform_2(%arg0: i32, %arg1: i32) -> (i32, i32) {
    %c0_i32 = arith.constant 0 : i32
    %c0_i32_0 = arith.constant 0 : i32
    return %arg0, %c0_i32 : i32, i32
  }
  func.func @transform_3(%arg0: i32, %arg1: i32) -> (i32, i32, i32) {
    %c0_i32 = arith.constant 0 : i32
    %c0_i32_0 = arith.constant 0 : i32
    %c0_i32_1 = arith.constant 0 : i32
    return %arg0, %c0_i32, %c0_i32_0 : i32, i32, i32
  }
}

</mosaic_0001>

<bundles_post_ra>
// kernel: tpu_custom_call.1
= control target key start
LH: loop header
LB: loop body
LE: loop exit
PB: predicated region body
PF: predicated region fallthrough
CT: control target
= control target key end

     0   :  { %9 = vsyncpa [#allocation3], 0  ;;  %s1305_s0 = inlined_call_operand.vmem [shape: bf16[128,48], index: 0, kind: input, shape index: {}]   ;;  %s1306_s1 = inlined_call_operand.hbm [shape: bf16[48,512], index: 1, kind: input, shape index: {}]   ;;  %s1307_s2 = inlined_call_operand.hbm [shape: f32[128,512], index: 2, kind: output, shape index: {0}]   ;;  %s1308_s3 = inlined_call_operand.hbm [shape: f32[1,2,512], index: 3, kind: output, shape index: {1}]  }
   0x1   :  { %10 = vsyncpa [#allocation4], 0 }
   0x2   :  { %11 = vsyncpa [#allocation7], 0  ;;  %s1171_s12 = smov [#allocation2]   ;;  %s1099_s16 = scalar_lea.hbm %s1306_s1, 1536 }
   0x3   :  { %s19_s13 = sshll.u32 %s1171_s12, 4  ;;  %p1100_p0 = scmp.ne.s32.totalorder %s1306_s1, %s1099_s16  ;;  %s20_s13 = int_to_ptr.vmem [resolvable:$true] %s19_s13 }
   0x4   :  { %p1103_p1 = scmp.lt.u32.totalorder %s1099_s16, %s1306_s1 }
   0x6   :  { %p1105_p2 = pnand %p1103_p1, %p1100_p0 }
   0x8   :  { %1108 = shalt.err (!%p1105_p2)
}
   0x9   :  { %s1109_s21 = scalar_lea.vmem %s20_s13, 1536  ;;  %p1114_p4 = scmp.lt.s32.totalorder %s20_s13, %s20_s13 }
   0xa   :  { %p1110_p3 = scmp.ne.s32.totalorder %s20_s13, %s1109_s21  ;;  %p1115_p5 = scmp.lt.s32.totalorder %s1109_s21, %s1109_s21 }
   0xc   :  { %p1116_p6 = por %p1115_p5, %p1114_p4 }
   0xe   :  { %p1117_p7 = pnand %p1116_p6, %p1110_p3 }
  0x10   :  { %1120 = shalt.err (!%p1117_p7)
}
  0x11   :  { %s1172_s22 = smov 256   ;;  %s1173_s23 = smov 16  }
  0x12   :  { %25 = dma.hbm_to_vmem [thread:$0]  %s1306_s1, 1536, %s20_s13, [#allocation3], %s1172_s22, %s1172_s22, %s1173_s23  }
  0x13   :  { %1165 = dma.done.wait [#allocation3], 1536  }
  0x14   :  { %1166 = vsyncadd [#allocation3], 4294965760  ;;  %v1174_v0 = vmov 0   ;;  %v1073_v1 = vld [vmem:[#allocation2 + $0x4] ss:$16 sps:$4 sm:$0xff]   ;;  %vm290_vm0 = vcmask 392192  }
  0x15   :  { %347 = vmatprep.mubr.bf16.mxu0 %v1174_v0  ;;  %460 = vmatprep.mubr.bf16.mxu1 %v1174_v0  ;;  %v1075_v2 = vld [vmem:[#allocation2 + $0xc] ss:$16 sps:$4 sm:$0xff]   ;;  %v1077_v3 = vld [vmem:[#allocation2] ss:$16 sps:$4 sm:$0xff]   ;;  %v1078_v4 = vld [vmem:[#allocation2 + $0x8] ss:$16 sps:$4 sm:$0xff]  }
  0x16   :  { %315 = vmatprep.subr.bf16.mxu0 %v1073_v1  ;;  %428 = vmatprep.subr.bf16.mxu1 %v1075_v2  ;;  %v1079_v5 = vld [vmem:[#allocation2 + $0x24] ss:$16 sps:$4 sm:$0xff]   ;;  %v1081_v6 = vld [vmem:[#allocation2 + $0x2c] ss:$16 sps:$4 sm:$0xff]   ;;  %v1083_v7 = vld [vmem:[#allocation2 + $0x20] ss:$16 sps:$4 sm:$0xff]  }
  0x17   :  { %316 = vmatpush1.bf16.msra.mxu0 %v1077_v3  ;;  %429 = vmatpush1.bf16.msra.mxu1 %v1078_v4  ;;  %v1084_v8 = vld [vmem:[#allocation2 + $0x28] ss:$16 sps:$4 sm:$0xff]   ;;  %v1085_v9 = vld [vmem:[#allocation2 + $0x44] ss:$16 sps:$4 sm:$0xff]   ;;  %v1087_v10 = vld [vmem:[#allocation2 + $0x4c] ss:$16 sps:$4 sm:$0xff]  }
  0x18   :  { %317 = vmatprep.subr.bf16.mxu0 %v1079_v5  ;;  %430 = vmatprep.subr.bf16.mxu1 %v1081_v6  ;;  %v1089_v11 = vld [vmem:[#allocation2 + $0x40] ss:$16 sps:$4 sm:$0xff]   ;;  %v1090_v12 = vld [vmem:[#allocation2 + $0x48] ss:$16 sps:$4 sm:$0xff]  }
  0x19   :  { %v1091_v13 = vld [vmem:[%s1305_s0] sm:$0xff]   ;;  %v1092_v14 = vld [vmem:[%s1305_s0 + $0x8] sm:$0xff]   ;;  %v1093_v15 = vld [vmem:[%s1305_s0 + $0x10] sm:$0xff]  }
  0x1a   :  { %v1094_v16 = vld [vmem:[%s1305_s0 + $0x18] sm:$0xff]   ;;  %v1095_v17 = vld [vmem:[%s1305_s0 + $0x20] sm:$0xff]   ;;  %v1096_v18 = vld [vmem:[%s1305_s0 + $0x28] sm:$0xff]  }
  0x1b   :  { %318 = vmatpush1.bf16.msra.mxu0 %v1083_v7  ;;  %431 = vmatpush1.bf16.msra.mxu1 %v1084_v8  ;;  %v1097_v19 = vld [vmem:[%s1305_s0 + $0x30] sm:$0xff]   ;;  %v1098_v20 = vld [vmem:[%s1305_s0 + $0x38] sm:$0xff]   ;;  %s1175_s0 = smov [#allocation5]  }
  0x1c   :  { %319 = vmatprep.subr.bf16.mxu0 %v1085_v9  ;;  %432 = vmatprep.subr.bf16.mxu1 %v1087_v10  ;;  %s1001_s14 = sshll.u32 %s1175_s0, 4  ;;  %s1266_s14 = int_to_ptr.vmem [resolvable:$true] %s1001_s14 }
  0x1d   :  { %s1121_s15 = scalar_lea.vmem %s1266_s14, 8192  ;;  %p1126_p9 = scmp.lt.s32.totalorder %s1266_s14, %s1266_s14 }
  0x1e   :  { %p1122_p8 = scmp.ne.s32.totalorder %s1266_s14, %s1121_s15  ;;  %p1127_p10 = scmp.lt.s32.totalorder %s1121_s15, %s1121_s15 }
  0x1f   :  { %320 = vmatpush1.bf16.msra.mxu0 %v1089_v11  ;;  %433 = vmatpush1.bf16.msra.mxu1 %v1090_v12 }
  0x20   :  { %p1128_p11 = por %p1127_p10, %p1126_p9 }
  0x22   :  { %1047 = vmatmul.mubr.msk.bf16.vlgmr.msra.gmra.mrb[0].mxu0 %vm290_vm0, %v1091_v13  ;;  %1055 = vmatmul.mubr.msk.bf16.vlgmr.msra.gmra.mrb[0].mxu1 %vm290_vm0, %v1091_v13  ;;  %p1129_p12 = pnand %p1128_p11, %p1122_p8 }
  0x23   :  { %357 = vmatprep.mubr.bf16.mxu0 %v1174_v0  ;;  %470 = vmatprep.mubr.bf16.mxu1 %v1174_v0 }
  0x2a   :  { %1048 = vmatmul.mubr.msk.bf16.gmra.mrb[4].mxu0 %vm290_vm0, %v1092_v14  ;;  %1056 = vmatmul.mubr.msk.bf16.gmra.mrb[4].mxu1 %vm290_vm0, %v1092_v14 }
  0x2b   :  { %367 = vmatprep.mubr.bf16.mxu0 %v1174_v0  ;;  %480 = vmatprep.mubr.bf16.mxu1 %v1174_v0 }
  0x32   :  { %1049 = vmatmul.mubr.msk.bf16.gmra.mrb[8].mxu0 %vm290_vm0, %v1093_v15  ;;  %1057 = vmatmul.mubr.msk.bf16.gmra.mrb[8].mxu1 %vm290_vm0, %v1093_v15 }
  0x33   :  { %377 = vmatprep.mubr.bf16.mxu0 %v1174_v0  ;;  %490 = vmatprep.mubr.bf16.mxu1 %v1174_v0 }
  0x3a   :  { %1050 = vmatmul.mubr.msk.bf16.gmra.mrb[12].mxu0 %vm290_vm0, %v1094_v16  ;;  %1058 = vmatmul.mubr.msk.bf16.gmra.mrb[12].mxu1 %vm290_vm0, %v1094_v16 }
  0x3b   :  { %387 = vmatprep.mubr.bf16.mxu0 %v1174_v0  ;;  %500 = vmatprep.mubr.bf16.mxu1 %v1174_v0 }
  0x42   :  { %1051 = vmatmul.mubr.msk.bf16.gmra.mrb[16].mxu0 %vm290_vm0, %v1095_v17  ;;  %1059 = vmatmul.mubr.msk.bf16.gmra.mrb[16].mxu1 %vm290_vm0, %v1095_v17 }
  0x43   :  { %397 = vmatprep.mubr.bf16.mxu0 %v1174_v0  ;;  %510 = vmatprep.mubr.bf16.mxu1 %v1174_v0 }
  0x4a   :  { %1052 = vmatmul.mubr.msk.bf16.gmra.mrb[20].mxu0 %vm290_vm0, %v1096_v18  ;;  %1060 = vmatmul.mubr.msk.bf16.gmra.mrb[20].mxu1 %vm290_vm0, %v1096_v18 }
  0x4b   :  { %407 = vmatprep.mubr.bf16.mxu0 %v1174_v0  ;;  %520 = vmatprep.mubr.bf16.mxu1 %v1174_v0 }
  0x52   :  { %1053 = vmatmul.mubr.msk.bf16.gmra.mrb[24].mxu0 %vm290_vm0, %v1097_v19  ;;  %1061 = vmatmul.mubr.msk.bf16.gmra.mrb[24].mxu1 %vm290_vm0, %v1097_v19 }
  0x53   :  { %417 = vmatprep.mubr.bf16.mxu0 %v1174_v0  ;;  %530 = vmatprep.mubr.bf16.mxu1 %v1174_v0 }
  0x5a   :  { %1054 = vmatmul.mubr.msk.bf16.gmra.mrb[28].mxu0 %vm290_vm0, %v1098_v20  ;;  %1062 = vmatmul.mubr.msk.bf16.gmra.mrb[28].mxu1 %vm290_vm0, %v1098_v20 }
  0xf5   :  { %v349_v21 = vpop.f32.mrb[0].mxu0  ;;  %v462_v22 = vpop.f32.mrb[0].mxu1 }
  0xf6   :  { %v351_v23 = vpop.f32.mrb[1].mxu0  ;;  %v464_v24 = vpop.f32.mrb[1].mxu1  ;;  %605 = vst [vmem:[#allocation5] sm:$0xff] %v349_v21  ;;  %v820_v27 = vmul.f32 %v349_v21, %v349_v21  ;;  %607 = vst [vmem:[#allocation5 + $0x10] sm:$0xff] %v462_v22  ;;  %v822_v28 = vmul.f32 %v462_v22, %v462_v22 }
  0xf7   :  { %v353_v25 = vpop.f32.mrb[2].mxu0  ;;  %v466_v26 = vpop.f32.mrb[2].mxu1  ;;  %606 = vst [vmem:[#allocation5 + $0x8] sm:$0xff] %v351_v23  ;;  %v821_v31 = vmul.f32 %v351_v23, %v351_v23  ;;  %608 = vst [vmem:[#allocation5 + $0x18] sm:$0xff] %v464_v24  ;;  %v823_v32 = vmul.f32 %v464_v24, %v464_v24 }
  0xf8   :  { %v355_v29 = vpop.f32.mrb[3].mxu0  ;;  %v468_v30 = vpop.f32.mrb[3].mxu1  ;;  %609 = vst [vmem:[#allocation5 + $0x20] sm:$0xff] %v353_v25  ;;  %v736_v33 = vadd.f32 %v353_v25, %v349_v21  ;;  %v824_v34 = vmul.f32 %v353_v25, %v353_v25  ;;  %611 = vst [vmem:[#allocation5 + $0x30] sm:$0xff] %v466_v26  ;;  %v778_v35 = vadd.f32 %v466_v26, %v462_v22 }
  0xf9   :  { %v826_v36 = vmul.f32 %v466_v26, %v466_v26  ;;  %610 = vst [vmem:[#allocation5 + $0x28] sm:$0xff] %v355_v29  ;;  %v757_v37 = vadd.f32 %v355_v29, %v351_v23  ;;  %v825_v38 = vmul.f32 %v355_v29, %v355_v29  ;;  %612 = vst [vmem:[#allocation5 + $0x38] sm:$0xff] %v468_v30 }
  0xfa   :  { %v799_v39 = vadd.f32 %v468_v30, %v464_v24  ;;  %v827_v40 = vmul.f32 %v468_v30, %v468_v30  ;;  %v884_v41 = vadd.f32 %v824_v34, %v820_v27 }
  0xfb   :  { %v926_v42 = vadd.f32 %v826_v36, %v822_v28  ;;  %v905_v43 = vadd.f32 %v825_v38, %v821_v31 }
  0xfc   :  { %v947_v44 = vadd.f32 %v827_v40, %v823_v32 }
  0xfd   :  { %v359_v45 = vpop.f32.mrb[4].mxu0  ;;  %v472_v46 = vpop.f32.mrb[4].mxu1 }
  0xfe   :  { %v361_v47 = vpop.f32.mrb[5].mxu0  ;;  %v474_v48 = vpop.f32.mrb[5].mxu1  ;;  %613 = vst [vmem:[#allocation5 + $0x40] sm:$0xff] %v359_v45  ;;  %v737_v51 = vadd.f32 %v736_v33, %v359_v45  ;;  %v828_v52 = vmul.f32 %v359_v45, %v359_v45  ;;  %615 = vst [vmem:[#allocation5 + $0x50] sm:$0xff] %v472_v46  ;;  %v779_v53 = vadd.f32 %v778_v35, %v472_v46 }
  0xff   :  { %v363_v49 = vpop.f32.mrb[6].mxu0  ;;  %v476_v50 = vpop.f32.mrb[6].mxu1  ;;  %v830_v54 = vmul.f32 %v472_v46, %v472_v46  ;;  %614 = vst [vmem:[#allocation5 + $0x48] sm:$0xff] %v361_v47  ;;  %v758_v57 = vadd.f32 %v757_v37, %v361_v47  ;;  %v829_v58 = vmul.f32 %v361_v47, %v361_v47  ;;  %616 = vst [vmem:[#allocation5 + $0x58] sm:$0xff] %v474_v48 }
 0x100   :  { %v365_v55 = vpop.f32.mrb[7].mxu0  ;;  %v478_v56 = vpop.f32.mrb[7].mxu1  ;;  %v800_v59 = vadd.f32 %v799_v39, %v474_v48  ;;  %v831_v60 = vmul.f32 %v474_v48, %v474_v48  ;;  %v885_v61 = vadd.f32 %v884_v41, %v828_v52  ;;  %617 = vst [vmem:[#allocation5 + $0x60] sm:$0xff] %v363_v49  ;;  %v738_v1 = vadd.f32 %v737_v51, %v363_v49 }
 0x101   :  { %v927_v62 = vadd.f32 %v926_v42, %v830_v54  ;;  %v906_v63 = vadd.f32 %v905_v43, %v829_v58  ;;  %v832_v2 = vmul.f32 %v363_v49, %v363_v49  ;;  %619 = vst [vmem:[#allocation5 + $0x70] sm:$0xff] %v476_v50  ;;  %v780_v3 = vadd.f32 %v779_v53, %v476_v50 }
 0x102   :  { %v948_v0 = vadd.f32 %v947_v44, %v831_v60  ;;  %v834_v4 = vmul.f32 %v476_v50, %v476_v50  ;;  %618 = vst [vmem:[#allocation5 + $0x68] sm:$0xff] %v365_v55  ;;  %v759_v5 = vadd.f32 %v758_v57, %v365_v55  ;;  %v833_v6 = vmul.f32 %v365_v55, %v365_v55 }
 0x103   :  { %620 = vst [vmem:[#allocation5 + $0x78] sm:$0xff] %v478_v56  ;;  %v801_v7 = vadd.f32 %v800_v59, %v478_v56  ;;  %v835_v8 = vmul.f32 %v478_v56, %v478_v56  ;;  %v886_v11 = vadd.f32 %v885_v61, %v832_v2 }
 0x104   :  { %v928_v12 = vadd.f32 %v927_v62, %v834_v4  ;;  %v907_v15 = vadd.f32 %v906_v63, %v833_v6 }
 0x105   :  { %v369_v9 = vpop.f32.mrb[8].mxu0  ;;  %v482_v10 = vpop.f32.mrb[8].mxu1  ;;  %v949_v16 = vadd.f32 %v948_v0, %v835_v8 }
 0x106   :  { %v371_v13 = vpop.f32.mrb[9].mxu0  ;;  %v484_v14 = vpop.f32.mrb[9].mxu1  ;;  %621 = vst [vmem:[#allocation5 + $0x80] sm:$0xff] %v369_v9  ;;  %v739_v19 = vadd.f32 %v738_v1, %v369_v9  ;;  %v836_v20 = vmul.f32 %v369_v9, %v369_v9  ;;  %623 = vst [vmem:[#allocation5 + $0x90] sm:$0xff] %v482_v10  ;;  %v781_v21 = vadd.f32 %v780_v3, %v482_v10 }
 0x107   :  { %v373_v17 = vpop.f32.mrb[10].mxu0  ;;  %v486_v18 = vpop.f32.mrb[10].mxu1  ;;  %v838_v22 = vmul.f32 %v482_v10, %v482_v10  ;;  %622 = vst [vmem:[#allocation5 + $0x88] sm:$0xff] %v371_v13  ;;  %v760_v25 = vadd.f32 %v759_v5, %v371_v13  ;;  %v837_v26 = vmul.f32 %v371_v13, %v371_v13  ;;  %624 = vst [vmem:[#allocation5 + $0x98] sm:$0xff] %v484_v14 }
 0x108   :  { %v375_v23 = vpop.f32.mrb[11].mxu0  ;;  %v488_v24 = vpop.f32.mrb[11].mxu1  ;;  %v802_v27 = vadd.f32 %v801_v7, %v484_v14  ;;  %v839_v28 = vmul.f32 %v484_v14, %v484_v14  ;;  %v887_v29 = vadd.f32 %v886_v11, %v836_v20  ;;  %625 = vst [vmem:[#allocation5 + $0xa0] sm:$0xff] %v373_v17  ;;  %v740_v33 = vadd.f32 %v739_v19, %v373_v17 }
 0x109   :  { %v929_v30 = vadd.f32 %v928_v12, %v838_v22  ;;  %v908_v31 = vadd.f32 %v907_v15, %v837_v26  ;;  %v840_v34 = vmul.f32 %v373_v17, %v373_v17  ;;  %627 = vst [vmem:[#allocation5 + $0xb0] sm:$0xff] %v486_v18  ;;  %v782_v35 = vadd.f32 %v781_v21, %v486_v18 }
 0x10a   :  { %v950_v32 = vadd.f32 %v949_v16, %v839_v28  ;;  %v842_v36 = vmul.f32 %v486_v18, %v486_v18  ;;  %626 = vst [vmem:[#allocation5 + $0xa8] sm:$0xff] %v375_v23  ;;  %v761_v37 = vadd.f32 %v760_v25, %v375_v23  ;;  %v841_v38 = vmul.f32 %v375_v23, %v375_v23 }
 0x10b   :  { %628 = vst [vmem:[#allocation5 + $0xb8] sm:$0xff] %v488_v24  ;;  %v803_v39 = vadd.f32 %v802_v27, %v488_v24  ;;  %v843_v40 = vmul.f32 %v488_v24, %v488_v24  ;;  %v888_v45 = vadd.f32 %v887_v29, %v840_v34 }
 0x10c   :  { %v930_v46 = vadd.f32 %v929_v30, %v842_v36  ;;  %v909_v49 = vadd.f32 %v908_v31, %v841_v38 }
 0x10d   :  { %v379_v41 = vpop.f32.mrb[12].mxu0  ;;  %v492_v42 = vpop.f32.mrb[12].mxu1  ;;  %v951_v50 = vadd.f32 %v950_v32, %v843_v40 }
 0x10e   :  { %v381_v43 = vpop.f32.mrb[13].mxu0  ;;  %v494_v44 = vpop.f32.mrb[13].mxu1  ;;  %629 = vst [vmem:[#allocation5 + $0xc0] sm:$0xff] %v379_v41  ;;  %v844_v51 = vmul.f32 %v379_v41, %v379_v41  ;;  %631 = vst [vmem:[#allocation5 + $0xd0] sm:$0xff] %v492_v42  ;;  %v846_v52 = vmul.f32 %v492_v42, %v492_v42  ;;  %v741_v57 = vadd.f32 %v740_v33, %v379_v41 }
 0x10f   :  { %v383_v47 = vpop.f32.mrb[14].mxu0  ;;  %v496_v48 = vpop.f32.mrb[14].mxu1  ;;  %630 = vst [vmem:[#allocation5 + $0xc8] sm:$0xff] %v381_v43  ;;  %v845_v55 = vmul.f32 %v381_v43, %v381_v43  ;;  %632 = vst [vmem:[#allocation5 + $0xd8] sm:$0xff] %v494_v44  ;;  %v847_v56 = vmul.f32 %v494_v44, %v494_v44  ;;  %v762_v58 = vadd.f32 %v761_v37, %v381_v43 }
 0x110   :  { %v385_v53 = vpop.f32.mrb[15].mxu0  ;;  %v498_v54 = vpop.f32.mrb[15].mxu1  ;;  %633 = vst [vmem:[#allocation5 + $0xe0] sm:$0xff] %v383_v47  ;;  %635 = vst [vmem:[#allocation5 + $0xf0] sm:$0xff] %v496_v48  ;;  %v783_v59 = vadd.f32 %v782_v35, %v492_v42  ;;  %v804_v60 = vadd.f32 %v803_v39, %v494_v44  ;;  %v889_v61 = vadd.f32 %v888_v45, %v844_v51 }
 0x111   :  { %634 = vst [vmem:[#allocation5 + $0xe8] sm:$0xff] %v385_v53  ;;  %636 = vst [vmem:[#allocation5 + $0xf8] sm:$0xff] %v498_v54  ;;  %v1252_v62 = vadd.f32 %v909_v49, %v845_v55  ;;  %v931_v63 = vadd.f32 %v930_v46, %v846_v52  ;;  %v1254_v0 = vadd.f32 %v951_v50, %v847_v56 }
 0x115   :  { %v389_v1 = vpop.f32.mrb[16].mxu0  ;;  %v502_v2 = vpop.f32.mrb[16].mxu1 }
 0x116   :  { %v391_v3 = vpop.f32.mrb[17].mxu0  ;;  %v504_v4 = vpop.f32.mrb[17].mxu1  ;;  %637 = vst [vmem:[#allocation5 + $0x100] sm:$0xff] %v389_v1  ;;  %639 = vst [vmem:[#allocation5 + $0x110] sm:$0xff] %v502_v2 }
 0x117   :  { %v393_v5 = vpop.f32.mrb[18].mxu0  ;;  %v506_v6 = vpop.f32.mrb[18].mxu1  ;;  %638 = vst [vmem:[#allocation5 + $0x108] sm:$0xff] %v391_v3  ;;  %640 = vst [vmem:[#allocation5 + $0x118] sm:$0xff] %v504_v4  ;;  %v700_v9 = vld [vmem:[#allocation5 + $0xe0] sm:$0xff]  ;;  %v702_v10 = vld [vmem:[#allocation5 + $0xf0] sm:$0xff] }
 0x118   :  { %v395_v7 = vpop.f32.mrb[19].mxu0  ;;  %v508_v8 = vpop.f32.mrb[19].mxu1  ;;  %641 = vst [vmem:[#allocation5 + $0x120] sm:$0xff] %v393_v5  ;;  %643 = vst [vmem:[#allocation5 + $0x130] sm:$0xff] %v506_v6  ;;  %v701_v11 = vld [vmem:[#allocation5 + $0xe8] sm:$0xff]  ;;  %v703_v12 = vld [vmem:[#allocation5 + $0xf8] sm:$0xff]  ;;  %v742_v15 = vadd.f32 %v741_v57, %v700_v9  ;;  %v784_v16 = vadd.f32 %v783_v59, %v702_v10  ;;  %v848_v17 = vmul.f32 %v700_v9, %v700_v9 }
 0x119   :  { %642 = vst [vmem:[#allocation5 + $0x128] sm:$0xff] %v395_v7  ;;  %644 = vst [vmem:[#allocation5 + $0x138] sm:$0xff] %v508_v8  ;;  %v850_v18 = vmul.f32 %v702_v10, %v702_v10  ;;  %v763_v21 = vadd.f32 %v762_v58, %v701_v11  ;;  %v805_v22 = vadd.f32 %v804_v60, %v703_v12 }
 0x11a   :  { %v849_v27 = vmul.f32 %v701_v11, %v701_v11  ;;  %v851_v28 = vmul.f32 %v703_v12, %v703_v12  ;;  %v890_v43 = vadd.f32 %v889_v61, %v848_v17 }
 0x11b   :  { %v932_v44 = vadd.f32 %v931_v63, %v850_v18 }
 0x11c   :  { %v911_v47 = vadd.f32 %v1252_v62, %v849_v27  ;;  %v953_v48 = vadd.f32 %v1254_v0, %v851_v28 }
 0x11d   :  { %v399_v13 = vpop.f32.mrb[20].mxu0  ;;  %v512_v14 = vpop.f32.mrb[20].mxu1  ;;  %v704_v25 = vld [vmem:[#allocation5 + $0x100] sm:$0xff]  ;;  %v706_v26 = vld [vmem:[#allocation5 + $0x110] sm:$0xff] }
 0x11e   :  { %v401_v19 = vpop.f32.mrb[21].mxu0  ;;  %v514_v20 = vpop.f32.mrb[21].mxu1  ;;  %645 = vst [vmem:[#allocation5 + $0x140] sm:$0xff] %v399_v13  ;;  %647 = vst [vmem:[#allocation5 + $0x150] sm:$0xff] %v512_v14  ;;  %v705_v31 = vld [vmem:[#allocation5 + $0x108] sm:$0xff]  ;;  %v707_v32 = vld [vmem:[#allocation5 + $0x118] sm:$0xff]  ;;  %v743_v33 = vadd.f32 %v742_v15, %v704_v25  ;;  %v785_v34 = vadd.f32 %v784_v16, %v706_v26  ;;  %v852_v41 = vmul.f32 %v704_v25, %v704_v25 }
 0x11f   :  { %v403_v23 = vpop.f32.mrb[22].mxu0  ;;  %v516_v24 = vpop.f32.mrb[22].mxu1  ;;  %646 = vst [vmem:[#allocation5 + $0x148] sm:$0xff] %v401_v19  ;;  %648 = vst [vmem:[#allocation5 + $0x158] sm:$0xff] %v514_v20  ;;  %v708_v35 = vld [vmem:[#allocation5 + $0x120] sm:$0xff]  ;;  %v710_v36 = vld [vmem:[#allocation5 + $0x130] sm:$0xff]  ;;  %v764_v37 = vadd.f32 %v763_v21, %v705_v31  ;;  %v806_v38 = vadd.f32 %v805_v22, %v707_v32  ;;  %v853_v42 = vmul.f32 %v705_v31, %v705_v31 }
 0x120   :  { %v405_v29 = vpop.f32.mrb[23].mxu0  ;;  %v518_v30 = vpop.f32.mrb[23].mxu1  ;;  %649 = vst [vmem:[#allocation5 + $0x160] sm:$0xff] %v403_v23  ;;  %651 = vst [vmem:[#allocation5 + $0x170] sm:$0xff] %v516_v24  ;;  %v709_v39 = vld [vmem:[#allocation5 + $0x128] sm:$0xff]  ;;  %v711_v40 = vld [vmem:[#allocation5 + $0x138] sm:$0xff]  ;;  %v744_v45 = vadd.f32 %v743_v33, %v708_v35  ;;  %v786_v46 = vadd.f32 %v785_v34, %v710_v36  ;;  %v854_v53 = vmul.f32 %v706_v26, %v706_v26 }
 0x121   :  { %650 = vst [vmem:[#allocation5 + $0x168] sm:$0xff] %v405_v29  ;;  %652 = vst [vmem:[#allocation5 + $0x178] sm:$0xff] %v518_v30  ;;  %v765_v51 = vadd.f32 %v764_v37, %v709_v39  ;;  %v807_v52 = vadd.f32 %v806_v38, %v711_v40  ;;  %v855_v54 = vmul.f32 %v707_v32, %v707_v32 }
 0x122   :  { %v856_v57 = vmul.f32 %v708_v35, %v708_v35  ;;  %v857_v58 = vmul.f32 %v709_v39, %v709_v39  ;;  %v891_v1 = vadd.f32 %v890_v43, %v852_v41  ;;  %v912_v2 = vadd.f32 %v911_v47, %v853_v42 }
 0x123   :  { %v858_v13 = vmul.f32 %v710_v36, %v710_v36  ;;  %v859_v14 = vmul.f32 %v711_v40, %v711_v40  ;;  %v933_v15 = vadd.f32 %v932_v44, %v854_v53  ;;  %v954_v16 = vadd.f32 %v953_v48, %v855_v54 }
 0x124   :  { %v892_v19 = vadd.f32 %v891_v1, %v856_v57  ;;  %v913_v20 = vadd.f32 %v912_v2, %v857_v58 }
 0x125   :  { %v409_v49 = vpop.f32.mrb[24].mxu0  ;;  %v522_v50 = vpop.f32.mrb[24].mxu1  ;;  %v712_v61 = vld [vmem:[#allocation5 + $0x140] sm:$0xff]  ;;  %v714_v63 = vld [vmem:[#allocation5 + $0x150] sm:$0xff] }
 0x126   :  { %v411_v55 = vpop.f32.mrb[25].mxu0  ;;  %v524_v56 = vpop.f32.mrb[25].mxu1  ;;  %653 = vst [vmem:[#allocation5 + $0x180] sm:$0xff] %v409_v49  ;;  %655 = vst [vmem:[#allocation5 + $0x190] sm:$0xff] %v522_v50  ;;  %v713_v3 = vld [vmem:[#allocation5 + $0x148] sm:$0xff]  ;;  %v715_v4 = vld [vmem:[#allocation5 + $0x158] sm:$0xff]  ;;  %v745_v5 = vadd.f32 %v744_v45, %v712_v61  ;;  %v787_v6 = vadd.f32 %v786_v46, %v714_v63  ;;  %v860_v17 = vmul.f32 %v712_v61, %v712_v61 }
 0x127   :  { %v413_v59 = vpop.f32.mrb[26].mxu0  ;;  %v526_v60 = vpop.f32.mrb[26].mxu1  ;;  %654 = vst [vmem:[#allocation5 + $0x188] sm:$0xff] %v411_v55  ;;  %656 = vst [vmem:[#allocation5 + $0x198] sm:$0xff] %v524_v56  ;;  %v716_v7 = vld [vmem:[#allocation5 + $0x160] sm:$0xff]  ;;  %v718_v8 = vld [vmem:[#allocation5 + $0x170] sm:$0xff]  ;;  %v766_v9 = vadd.f32 %v765_v51, %v713_v3  ;;  %v808_v10 = vadd.f32 %v807_v52, %v715_v4  ;;  %v861_v18 = vmul.f32 %v713_v3, %v713_v3 }
 0x128   :  { %v415_v62 = vpop.f32.mrb[27].mxu0  ;;  %v528_v0 = vpop.f32.mrb[27].mxu1  ;;  %657 = vst [vmem:[#allocation5 + $0x1a0] sm:$0xff] %v413_v59  ;;  %659 = vst [vmem:[#allocation5 + $0x1b0] sm:$0xff] %v526_v60  ;;  %v717_v11 = vld [vmem:[#allocation5 + $0x168] sm:$0xff]  ;;  %v719_v12 = vld [vmem:[#allocation5 + $0x178] sm:$0xff]  ;;  %v746_v21 = vadd.f32 %v745_v5, %v716_v7  ;;  %v788_v23 = vadd.f32 %v787_v6, %v718_v8  ;;  %v1258_v27 = vmul.f32 %v714_v63, %v714_v63 }
 0x129   :  { %658 = vst [vmem:[#allocation5 + $0x1a8] sm:$0xff] %v415_v62  ;;  %660 = vst [vmem:[#allocation5 + $0x1b8] sm:$0xff] %v528_v0  ;;  %v767_v22 = vadd.f32 %v766_v9, %v717_v11  ;;  %v809_v24 = vadd.f32 %v808_v10, %v719_v12  ;;  %v1260_v28 = vmul.f32 %v715_v4, %v715_v4 }
 0x12a   :  { %v864_v29 = vmul.f32 %v716_v7, %v716_v7  ;;  %v865_v30 = vmul.f32 %v717_v11, %v717_v11  ;;  %v1262_v33 = vmul.f32 %v718_v8, %v718_v8  ;;  %v1264_v34 = vmul.f32 %v719_v12, %v719_v12 }
 0x12b   :  { %v893_v39 = vadd.f32 %v892_v19, %v860_v17  ;;  %v914_v40 = vadd.f32 %v913_v20, %v861_v18  ;;  %v934_v55 = vadd.f32 %v933_v15, %v858_v13  ;;  %v955_v56 = vadd.f32 %v954_v16, %v859_v14 }
 0x12d   :  { %v419_v25 = vpop.f32.mrb[28].mxu0  ;;  %v532_v26 = vpop.f32.mrb[28].mxu1  ;;  %v720_v37 = vld [vmem:[#allocation5 + $0x180] sm:$0xff]  ;;  %v722_v38 = vld [vmem:[#allocation5 + $0x190] sm:$0xff]  ;;  %v894_v59 = vadd.f32 %v893_v39, %v864_v29  ;;  %v915_v60 = vadd.f32 %v914_v40, %v865_v30 }
 0x12e   :  { %v421_v31 = vpop.f32.mrb[29].mxu0  ;;  %v534_v32 = vpop.f32.mrb[29].mxu1  ;;  %661 = vst [vmem:[#allocation5 + $0x1c0] sm:$0xff] %v419_v25  ;;  %663 = vst [vmem:[#allocation5 + $0x1d0] sm:$0xff] %v532_v26  ;;  %v721_v43 = vld [vmem:[#allocation5 + $0x188] sm:$0xff]  ;;  %v723_v44 = vld [vmem:[#allocation5 + $0x198] sm:$0xff]  ;;  %v747_v45 = vadd.f32 %v746_v21, %v720_v37  ;;  %v789_v46 = vadd.f32 %v788_v23, %v722_v38  ;;  %v868_v53 = vmul.f32 %v720_v37, %v720_v37 }
 0x12f   :  { %v423_v35 = vpop.f32.mrb[30].mxu0  ;;  %v536_v36 = vpop.f32.mrb[30].mxu1  ;;  %662 = vst [vmem:[#allocation5 + $0x1c8] sm:$0xff] %v421_v31  ;;  %664 = vst [vmem:[#allocation5 + $0x1d8] sm:$0xff] %v534_v32  ;;  %v724_v47 = vld [vmem:[#allocation5 + $0x1a0] sm:$0xff]  ;;  %v726_v48 = vld [vmem:[#allocation5 + $0x1b0] sm:$0xff]  ;;  %v768_v49 = vadd.f32 %v767_v22, %v721_v43  ;;  %v810_v50 = vadd.f32 %v809_v24, %v723_v44  ;;  %v869_v54 = vmul.f32 %v721_v43, %v721_v43 }
 0x130   :  { %v425_v41 = vpop.f32.mrb[31].mxu0  ;;  %v538_v42 = vpop.f32.mrb[31].mxu1  ;;  %665 = vst [vmem:[#allocation5 + $0x1e0] sm:$0xff] %v423_v35  ;;  %667 = vst [vmem:[#allocation5 + $0x1f0] sm:$0xff] %v536_v36  ;;  %v725_v51 = vld [vmem:[#allocation5 + $0x1a8] sm:$0xff]  ;;  %v727_v52 = vld [vmem:[#allocation5 + $0x1b8] sm:$0xff]  ;;  %v748_v57 = vadd.f32 %v747_v45, %v724_v47  ;;  %v790_v58 = vadd.f32 %v789_v46, %v726_v48 }
 0x131   :  { %666 = vst [vmem:[#allocation5 + $0x1e8] sm:$0xff] %v425_v41  ;;  %668 = vst [vmem:[#allocation5 + $0x1f8] sm:$0xff] %v538_v42 }
 0x132   :  { %1132 = shalt.err (!%p1129_p12)
}
 0x133   :  { %s1133_s18 = scalar_lea.hbm %s1307_s2, 8192 }
 0x134   :  { %p1134_p13 = scmp.ne.s32.totalorder %s1307_s2, %s1133_s18  ;;  %p1137_p0 = scmp.lt.u32.totalorder %s1133_s18, %s1307_s2 }
 0x136   :  { %p1139_p1 = pnand %p1137_p0, %p1134_p13 }
 0x138   :  { %1142 = shalt.err (!%p1139_p1)
}
 0x139   :  { %s1176_s23 = smov 512   ;;  %s1177_s24 = smov 32   ;;  %v769_v61 = vadd.f32 %v768_v49, %v725_v51  ;;  %v811_v63 = vadd.f32 %v810_v50, %v727_v52  ;;  %v872_v1 = vmul.f32 %v724_v47, %v724_v47  ;;  %v873_v2 = vmul.f32 %v725_v51, %v725_v51  ;;  %v728_v9 = vld [vmem:[#allocation5 + $0x1c0] sm:$0xff]  ;;  %v730_v10 = vld [vmem:[#allocation5 + $0x1d0] sm:$0xff]  ;;  %v729_v15 = vld [vmem:[#allocation5 + $0x1c8] sm:$0xff] }
 0x13a   :  { %1007 = dma.vmem_to_hbm [thread:$0]  %s1266_s14, 8192, %s1307_s2, [#allocation4], %s1176_s23, %s1176_s23, %s1177_s24   ;;  %v895_v62 = vadd.f32 %v894_v59, %v868_v53  ;;  %v916_v0 = vadd.f32 %v915_v60, %v869_v54  ;;  %v935_v3 = vadd.f32 %v934_v55, %v1258_v27  ;;  %v956_v4 = vadd.f32 %v955_v56, %v1260_v28  ;;  %v731_v16 = vld [vmem:[#allocation5 + $0x1d8] sm:$0xff]  ;;  %v732_v21 = vld [vmem:[#allocation5 + $0x1e0] sm:$0xff]  ;;  %v734_v22 = vld [vmem:[#allocation5 + $0x1f0] sm:$0xff] }
 0x13b   :  { %v870_v5 = vmul.f32 %v722_v38, %v722_v38  ;;  %v871_v6 = vmul.f32 %v723_v44, %v723_v44  ;;  %v874_v7 = vmul.f32 %v726_v48, %v726_v48  ;;  %v875_v8 = vmul.f32 %v727_v52, %v727_v52  ;;  %v733_v27 = vld [vmem:[#allocation5 + $0x1e8] sm:$0xff]  ;;  %v735_v28 = vld [vmem:[#allocation5 + $0x1f8] sm:$0xff]  ;;  %s1179_s2 = smov [#allocation6]  }
 0x13c   :  { %v896_v11 = vadd.f32 %v895_v62, %v872_v1  ;;  %v917_v12 = vadd.f32 %v916_v0, %v873_v2  ;;  %v936_v13 = vadd.f32 %v935_v3, %v1262_v33  ;;  %v957_v14 = vadd.f32 %v956_v4, %v1264_v34  ;;  %s1014_s26 = sshll.u32 %s1179_s2, 4  ;;  %s1015_s26 = int_to_ptr.vmem [resolvable:$true] %s1014_s26 }
 0x13d   :  { %v749_v17 = vadd.f32 %v748_v57, %v728_v9  ;;  %v791_v18 = vadd.f32 %v790_v58, %v730_v10  ;;  %v876_v19 = vmul.f32 %v728_v9, %v728_v9  ;;  %v878_v20 = vmul.f32 %v730_v10, %v730_v10  ;;  %s1143_s27 = scalar_lea.vmem %s1015_s26, 128  ;;  %p1148_p3 = scmp.lt.s32.totalorder %s1015_s26, %s1015_s26 }
 0x13e   :  { %v770_v23 = vadd.f32 %v769_v61, %v729_v15  ;;  %v812_v24 = vadd.f32 %v811_v63, %v731_v16  ;;  %v877_v25 = vmul.f32 %v729_v15, %v729_v15  ;;  %v879_v26 = vmul.f32 %v731_v16, %v731_v16  ;;  %p1144_p2 = scmp.ne.s32.totalorder %s1015_s26, %s1143_s27  ;;  %p1149_p4 = scmp.lt.s32.totalorder %s1143_s27, %s1143_s27 }
 0x13f   :  { %v750_v29 = vadd.f32 %v749_v17, %v732_v21  ;;  %v792_v30 = vadd.f32 %v791_v18, %v734_v22  ;;  %v880_v31 = vmul.f32 %v732_v21, %v732_v21  ;;  %v882_v32 = vmul.f32 %v734_v22, %v734_v22 }
 0x140   :  { %v771_v33 = vadd.f32 %v770_v23, %v733_v27  ;;  %v813_v34 = vadd.f32 %v812_v24, %v735_v28  ;;  %v881_v35 = vmul.f32 %v733_v27, %v733_v27  ;;  %v883_v36 = vmul.f32 %v735_v28, %v735_v28  ;;  %p1150_p5 = por %p1149_p4, %p1148_p3 }
 0x141   :  { %v751_v37 = vrot.slane %v750_v29, 4  ;;  %v793_v38 = vrot.slane %v792_v30, 4  ;;  %v897_v39 = vadd.f32 %v896_v11, %v876_v19  ;;  %v918_v40 = vadd.f32 %v917_v12, %v877_v25 }
 0x142   :  { %v772_v41 = vrot.slane %v771_v33, 4  ;;  %v814_v42 = vrot.slane %v813_v34, 4  ;;  %v937_v43 = vadd.f32 %v936_v13, %v870_v5  ;;  %v958_v44 = vadd.f32 %v957_v14, %v871_v6  ;;  %p1151_p6 = pnand %p1150_p5, %p1144_p2 }
 0x143   :  { %v752_v45 = vadd.f32 %v751_v37, %v750_v29  ;;  %v794_v46 = vadd.f32 %v793_v38, %v792_v30  ;;  %v898_v47 = vadd.f32 %v897_v39, %v880_v31  ;;  %v919_v48 = vadd.f32 %v918_v40, %v881_v35 }
 0x144   :  { %v773_v49 = vadd.f32 %v772_v41, %v771_v33  ;;  %v815_v50 = vadd.f32 %v814_v42, %v813_v34  ;;  %v938_v51 = vadd.f32 %v937_v43, %v874_v7  ;;  %v959_v52 = vadd.f32 %v958_v44, %v875_v8 }
 0x145   :  { %v753_v53 = vrot.slane %v752_v45, 2  ;;  %v899_v54 = vrot.slane %v898_v47, 4  ;;  %v920_v55 = vrot.slane %v919_v48, 4  ;;  %v795_v60 = vrot.slane %v794_v46, 2 }
 0x146   :  { %v774_v56 = vrot.slane %v773_v49, 2  ;;  %v939_v57 = vadd.f32 %v938_v51, %v878_v20  ;;  %v960_v58 = vadd.f32 %v959_v52, %v879_v26  ;;  %v816_v2 = vrot.slane %v815_v50, 2 }
 0x147   :  { %v754_v59 = vadd.f32 %v753_v53, %v752_v45  ;;  %v900_v61 = vadd.f32 %v899_v54, %v898_v47  ;;  %v921_v63 = vadd.f32 %v920_v55, %v919_v48  ;;  %v1178_v7 = vmov 1983009808  }
 0x148   :  { %v775_v1 = vadd.f32 %v774_v56, %v773_v49  ;;  %v940_v62 = vadd.f32 %v939_v57, %v882_v32  ;;  %v961_v0 = vadd.f32 %v960_v58, %v883_v36  ;;  %v980_v8 = vunpack.c.l.s4 %v1178_v7 }
 0x149   :  { %v901_v3 = vrot.slane %v900_v61, 2  ;;  %v922_v4 = vrot.slane %v921_v63, 2  ;;  %v982_v9 = vlaneseq  ;;  %v755_v10 = vrot.slane %v754_v59, 1 }
 0x14a   :  { %v941_v5 = vrot.slane %v940_v62, 4  ;;  %v962_v6 = vrot.slane %v961_v0, 4  ;;  %v776_v11 = vrot.slane %v775_v1, 1  ;;  %v796_v14 = vadd.f32 %v795_v60, %v794_v46 }
 0x14b   :  { %v902_v12 = vadd.f32 %v901_v3, %v900_v61  ;;  %v923_v13 = vadd.f32 %v922_v4, %v921_v63  ;;  %v817_v15 = vadd.f32 %v816_v2, %v815_v50  ;;  %vm968_vm1 = vcmask 1040384  }
 0x14c   :  { %v942_v16 = vadd.f32 %v941_v5, %v940_v62  ;;  %v963_v17 = vadd.f32 %v962_v6, %v961_v0  ;;  %v981_v22 = vunpack.c.0.s8 %v980_v8  ;;  %v983_v23 = vshrl.u32 %v982_v9, 7 }
 0x14d   :  { %v903_v18 = vrot.slane %v902_v12, 1  ;;  %v924_v19 = vrot.slane %v923_v13, 1  ;;  %v756_v24 = vadd.f32 %v755_v10, %v754_v59  ;;  %v777_v25 = vadd.f32 %v776_v11, %v775_v1 }
 0x14e   :  { %v943_v20 = vrot.slane %v942_v16, 2  ;;  %v964_v21 = vrot.slane %v963_v17, 2  ;;  %v797_v28 = vrot.slane %v796_v14, 1  ;;  %v818_v29 = vrot.slane %v817_v15, 1 }
 0x14f   :  { %v904_v26 = vadd.f32 %v903_v18, %v902_v12  ;;  %v925_v27 = vadd.f32 %v924_v19, %v923_v13  ;;  %v984_v37 = vsub.s32 %v981_v22, %v983_v23 }
 0x150   :  { %v944_v30 = vadd.f32 %v943_v20, %v942_v16  ;;  %v965_v31 = vadd.f32 %v964_v21, %v963_v17  ;;  %v798_v38 = vadd.f32 %v797_v28, %v796_v14  ;;  %v819_v39 = vadd.f32 %v818_v29, %v817_v15 }
 0x151   :  { %v969_v32 = vsel %vm968_vm1, %v756_v24, %v904_v26  ;;  %v970_v33 = vsel %vm968_vm1, %v777_v25, %v925_v27 }
 0x152   :  { %v945_v34 = vrot.slane %v944_v30, 1  ;;  %v966_v35 = vrot.slane %v965_v31, 1  ;;  %v977_v36 = vcombine.low %v969_v32, %v970_v33 }
 0x154   :  { %v946_v40 = vadd.f32 %v945_v34, %v944_v30  ;;  %v967_v41 = vadd.f32 %v966_v35, %v965_v31  ;;  %v985_v45 = vrot.slane %v977_v36, %v984_v37 }
 0x156   :  { %v971_v42 = vsel %vm968_vm1, %v798_v38, %v946_v40  ;;  %v972_v43 = vsel %vm968_vm1, %v819_v39, %v967_v41 }
 0x157   :  { %v978_v44 = vcombine.low %v971_v42, %v972_v43 }
 0x159   :  { %v992_v46 = vrot.slane %v978_v44, %v984_v37 }
 0x15b   :  { %v993_v47 = vcombine.low %v985_v45, %v992_v46 }
 0x15d   :  { %995 = vst [vmem:[#allocation6] sm:$0xff] %v993_v47 }
 0x15e   :  { %1154 = shalt.err (!%p1151_p6)
}
 0x15f   :  { %s1155_s30 = scalar_lea.hbm %s1308_s3, 128 }
 0x160   :  { %p1156_p7 = scmp.ne.s32.totalorder %s1308_s3, %s1155_s30  ;;  %p1159_p8 = scmp.lt.u32.totalorder %s1155_s30, %s1308_s3 }
 0x162   :  { %p1161_p9 = pnand %p1159_p8, %p1156_p7 }
 0x164   :  { %1164 = shalt.err (!%p1161_p9)
}
 0x165   :  { %1017 = dma.vmem_to_hbm [thread:$0]  %s1015_s26, 128, %s1308_s3, [#allocation7]  }
 0x166   :  { %1167 = dma.done.wait [#allocation4], 8192  }
 0x167   :  { %1168 = vsyncadd [#allocation4], 4294959104 }
 0x168   :  { %1169 = dma.done.wait [#allocation7], 128  }
 0x169   :  { %1170 = vsyncadd [#allocation7], 4294967168 }
 0x16a   :  { %1024 = vsyncpa [#allocation3], 1 }
 0x16b   :  { %1025 = vsyncpa [#allocation4], 1 }
 0x16c   :  { %1026 = vsyncpa [#allocation7], 1 }

</bundles_post_ra>
